<compile_context>
chip_gen: v6e
topology: v6e:2x2x1
jax: 0.10.0
libtpu: 0.0.40
codegen_flags: <defaults>
</compile_context>

<pallas_src>
import functools

import jax
import jax.numpy as jnp
import numpy as np
from jax import lax
from jax.experimental import pallas as pl
from jax.experimental.pallas import tpu as pltpu

EPS = 1e-12  # matches the PyTorch module (BERT-style LayerNorm eps)


def _round_up(x, m):
    return (x + m - 1) // m * m


def _cdiv(a, b):
    return (a + b - 1) // b


def _vmem_caps():
    """Return (capacity, usable budget) in bytes, generation aware."""
    cap = 64 << 20  # conservative (v7x-sized) fallback if the query fails
    try:
        cap = int(getattr(pltpu.get_tpu_info(), "vmem_capacity_bytes", cap))
    except Exception:
        pass
    return cap, (cap * 3) // 4  # ~96 MiB usable on v5e/v6e, ~48 MiB on v7x


def _layernorm_rows(h, g, be, h_real):
    """Row LayerNorm of an f32 tile whose padded lanes are exactly zero.

    Single-pass statistics (sum and sum-of-squares) halve the cross-lane XLU
    reduction work vs. mean-then-centered-variance. Padded lanes contribute 0
    to both sums; gamma/beta are zero-padded so padded output lanes stay zero
    (and are sliced off by the wrapper anyway).
    """
    inv_h = jnp.float32(1.0 / h_real)
    mean = jnp.sum(h, axis=-1, keepdims=True) * inv_h
    mean_sq = jnp.sum(h * h, axis=-1, keepdims=True) * inv_h
    var = jnp.maximum(mean_sq - mean * mean, jnp.float32(0.0))
    xn = (h - mean) * lax.rsqrt(var + jnp.float32(EPS))
    return g.astype(jnp.float32) * xn + be.astype(jnp.float32)


def _kernel_resident(x_ref, w_ref, b_ref, res_ref, g_ref, be_ref, o_ref, *, h_real):
    """Weight fully resident in VMEM: full-K matmul + fused epilogue."""
    h = jnp.dot(x_ref[...], w_ref[...], preferred_element_type=jnp.float32)
    h = h + b_ref[...].astype(jnp.float32) + res_ref[...].astype(jnp.float32)
    o_ref[...] = _layernorm_rows(h, g_ref[...], be_ref[...], h_real).astype(o_ref.dtype)


def _kernel_ktiled(x_ref, w_ref, b_ref, res_ref, g_ref, be_ref, o_ref, acc_ref, *, h_real):
    """Fallback for weights too large for VMEM: K-tiled accumulation."""
    k = pl.program_id(1)

    @pl.when(k == 0)
    def _():
        # Fold the bias into the accumulator init (overlaps the first W DMA).
        acc_ref[...] = jnp.broadcast_to(b_ref[...].astype(jnp.float32), acc_ref.shape)

    acc_ref[...] += jnp.dot(x_ref[...], w_ref[...], preferred_element_type=jnp.float32)

    @pl.when(k == pl.num_programs(1) - 1)
    def _():
        h = acc_ref[...] + res_ref[...].astype(jnp.float32)
        o_ref[...] = _layernorm_rows(h, g_ref[...], be_ref[...], h_real).astype(o_ref.dtype)


def make_output_forward(w, b, gamma, beta, *, compute_dtype=None):
    """Pad/cast the parameters once and return a jitted forward function
    (hidden_states, input_tensor) -> LayerNorm(hidden_states @ W + b + input_tensor).

    Pass compute_dtype=jnp.bfloat16 to run the matmul operands (x, W and the
    residual DMA) in bf16 with f32 MXU accumulation; default keeps input dtype.
    """
    I, H = w.shape
    w_dt = jnp.dtype(compute_dtype) if compute_dtype is not None else jnp.dtype(w.dtype)
    itemsize = lambda dt: jnp.dtype(dt).itemsize

    # Lane-dense output: pad H to 128 (skipped when already aligned). Bump to
    # 256 alignment (v6e/v7x MXU width) only when the extra columns are cheap.
    H_pad = _round_up(H, 128)
    if H_pad % 256 != 0 and (_round_up(H, 256) - H) * 8 <= H:
        H_pad = _round_up(H, 256)

    cap, budget = _vmem_caps()

    # Decide once whether W can stay resident (count a double-buffered weight
    # block to be safe) -- if so, the K grid axis is dropped entirely.
    w_block_bytes = 2 * I * H_pad * itemsize(w_dt)
    min_tiles_bytes = 2 * 8 * I * 4 + 8 * 8 * H_pad * 4  # tiny-TM tiles + params (f32 worst case)
    resident = (w_block_bytes + min_tiles_bytes) <= budget

    # ---- pad / cast parameters ONCE (hoisted out of the per-call hot path) ----
    wp = w.astype(w_dt)
    if H_pad != H:
        wp = jnp.pad(wp, ((0, 0), (0, H_pad - H)))
        b2 = jnp.pad(b, (0, H_pad - H))
        g2 = jnp.pad(gamma, (0, H_pad - H))
        be2 = jnp.pad(beta, (0, H_pad - H))
    else:
        b2, g2, be2 = b, gamma, beta
    b2 = b2.reshape(1, H_pad)
    g2 = g2.reshape(1, H_pad)
    be2 = be2.reshape(1, H_pad)

    if resident:
        TK, I_pad = I, I
    else:
        # Largest TK whose two weight panels use at most ~half the budget.
        TK = 256
        for cand in (2048, 1024, 512):
            if 2 * cand * H_pad * itemsize(w_dt) <= budget // 2:
                TK = cand
                break
        I_pad = _round_up(I, TK)
        if I_pad != I:
            wp = jnp.pad(wp, ((0, I_pad - I), (0, 0)))

    def _pick_tm(m_rows, fits):
        m_cap = _round_up(m_rows, 8)
        tm = 8
        for cand in (1024, 512, 256, 128, 64, 32, 16, 8):
            if cand <= m_cap and fits(cand):
                tm = cand
                break
        # Megacore: ensure >=2 parallel row tiles when there is enough work.
        if _cdiv(m_rows, tm) == 1 and m_rows >= 512:
            tm = _round_up(_cdiv(m_rows, 2), 8)
        return tm

    @jax.jit
    def forward(hidden_states, input_tensor):
        B, S, I_in = hidden_states.shape
        assert I_in == I and input_tensor.shape[-1] == H
        M = B * S
        out_dtype = jnp.result_type(hidden_states.dtype, input_tensor.dtype)
        x_dt = jnp.dtype(compute_dtype) if compute_dtype is not None else hidden_states.dtype
        r_dt = jnp.dtype(compute_dtype) if compute_dtype is not None else input_tensor.dtype
        xs, rs, osz = itemsize(x_dt), itemsize(r_dt), itemsize(out_dtype)

        x2 = hidden_states.reshape(M, I).astype(x_dt)
        r2 = input_tensor.reshape(M, H).astype(r_dt)
        if H_pad != H:
            r2 = jnp.pad(r2, ((0, 0), (0, H_pad - H)))

        if resident:
            def footprint(tm):
                return (2 * tm * I * xs            # x tiles (double buffered)
                        + w_block_bytes            # resident weight block
                        + 2 * tm * H_pad * rs      # residual tiles
                        + 2 * tm * H_pad * osz     # output tiles
                        + tm * H_pad * 4           # f32 `h` temporary
                        + 8 * H_pad * 4)           # bias / gamma / beta

            TM = _pick_tm(M, lambda tm: footprint(tm) <= budget)
            grid = (_cdiv(M, TM),)
            vmem_limit = min(max(int(footprint(TM)) * 5 // 4, 32 << 20), cap - (4 << 20))

            out = pl.pallas_call(
                functools.partial(_kernel_resident, h_real=H),
                out_shape=jax.ShapeDtypeStruct((M, H_pad), out_dtype),
                grid_spec=pltpu.PrefetchScalarGridSpec(
                    num_scalar_prefetch=0,
                    grid=grid,
                    in_specs=[
                        pl.BlockSpec((TM, I), lambda i: (i, 0)),        # x
                        pl.BlockSpec((I, H_pad), lambda i: (0, 0)),     # W (resident)
                        pl.BlockSpec((1, H_pad), lambda i: (0, 0)),     # bias
                        pl.BlockSpec((TM, H_pad), lambda i: (i, 0)),    # residual
                        pl.BlockSpec((1, H_pad), lambda i: (0, 0)),     # gamma
                        pl.BlockSpec((1, H_pad), lambda i: (0, 0)),     # beta
                    ],
                    out_specs=pl.BlockSpec((TM, H_pad), lambda i: (i, 0)),
                ),
                compiler_params=pltpu.CompilerParams(
                    dimension_semantics=("parallel",),
                    vmem_limit_bytes=vmem_limit,
                ),
            )(x2, wp, b2, r2, g2, be2)
        else:
            # TODO(synk): per-call pad of x along K only when TK does not divide I;
            # a ragged last K step would avoid this extra HBM copy.
            if I_pad != I:
                x2 = jnp.pad(x2, ((0, 0), (0, I_pad - I)))

            def footprint(tm):
                return (2 * tm * TK * xs
                        + 2 * TK * H_pad * itemsize(w_dt)
                        + 2 * tm * H_pad * rs       # residual is fetched once per i
                        + 2 * tm * H_pad * osz
                        + tm * H_pad * 4            # f32 accumulator scratch
                        + tm * H_pad * 4            # epilogue temporary headroom
                        + 8 * H_pad * 4)

            TM = _pick_tm(M, lambda tm: footprint(tm) <= budget)
            grid = (_cdiv(M, TM), I_pad // TK)
            vmem_limit = min(max(int(footprint(TM)) * 5 // 4, 32 << 20), cap - (4 << 20))

            out = pl.pallas_call(
                functools.partial(_kernel_ktiled, h_real=H),
                out_shape=jax.ShapeDtypeStruct((M, H_pad), out_dtype),
                grid_spec=pltpu.PrefetchScalarGridSpec(
                    num_scalar_prefetch=0,
                    grid=grid,
                    in_specs=[
                        pl.BlockSpec((TM, TK), lambda i, k: (i, k)),      # x
                        pl.BlockSpec((TK, H_pad), lambda i, k: (k, 0)),   # W panel
                        pl.BlockSpec((1, H_pad), lambda i, k: (0, 0)),    # bias
                        pl.BlockSpec((TM, H_pad), lambda i, k: (i, 0)),   # residual
                        pl.BlockSpec((1, H_pad), lambda i, k: (0, 0)),    # gamma
                        pl.BlockSpec((1, H_pad), lambda i, k: (0, 0)),    # beta
                    ],
                    out_specs=pl.BlockSpec((TM, H_pad), lambda i, k: (i, 0)),
                    scratch_shapes=[pltpu.VMEM((TM, H_pad), jnp.float32)],
                ),
                compiler_params=pltpu.CompilerParams(
                    dimension_semantics=("parallel", "arbitrary"),
                    vmem_limit_bytes=vmem_limit,
                ),
            )(x2, wp, b2, r2, g2, be2)

        if H_pad != H:
            out = out[:, :H]
        return out.reshape(B, S, H)

    return forward


def init_params(key, intermediate_size, hidden_size, dtype=jnp.float32):
    """Deterministic init matching the PyTorch module's reset_params logic."""
    k1, k2, k3 = jax.random.split(key, 3)
    # Linear: uniform(+-sqrt(6/(fan_in+fan_out))), bias zero
    wb = np.sqrt(6.0 / (intermediate_size + hidden_size))
    w = jax.random.uniform(k1, (intermediate_size, hidden_size),
                           minval=-wb, maxval=wb, dtype=dtype)
    b = jnp.zeros((hidden_size,), dtype=dtype)
    # LayerNorm: both weight and bias uniform(+-sqrt(6/fan_out))
    lb = np.sqrt(6.0 / hidden_size)
    gamma = jax.random.uniform(k2, (hidden_size,), minval=-lb, maxval=lb, dtype=dtype)
    beta = jax.random.uniform(k3, (hidden_size,), minval=-lb, maxval=lb, dtype=dtype)
    return w, b, gamma, beta


def reference_forward(hidden_states, input_tensor, w, b, gamma, beta):
    h = jnp.einsum("bsi,ih->bsh", hidden_states, w) + b
    h = h + input_tensor
    u = jnp.mean(h, axis=-1, keepdims=True)
    s = jnp.mean((h - u) ** 2, axis=-1, keepdims=True)
    xn = (h - u) / jnp.sqrt(s + EPS)
    return gamma * xn + beta


if __name__ == "__main__":
    B, S = 2, 8
    intermediate_size, hidden_size = 64, 32

    key = jax.random.PRNGKey(0)
    kx, kr, kp = jax.random.split(key, 3)

    hidden_states = jax.random.normal(kx, (B, S, intermediate_size), dtype=jnp.float32)
    input_tensor = jax.random.normal(kr, (B, S, hidden_size), dtype=jnp.float32)
    w, b, gamma, beta = init_params(kp, intermediate_size, hidden_size)

    # Default compute dtype = input dtype (f32) so the numerics match the
    # reference; pass compute_dtype=jnp.bfloat16 for the bf16-MXU fast path.
    fwd = make_output_forward(w, b, gamma, beta)
    out = jax.block_until_ready(fwd(hidden_states, input_tensor))

    ref = reference_forward(hidden_states, input_tensor, w, b, gamma, beta)
    np.testing.assert_allclose(np.asarray(out), np.asarray(ref), rtol=1e-5, atol=1e-5)

    print("KERNEL_OK")
</pallas_src>

<mosaic_0001>
module attributes {stable_mosaic.version = 11 : i64} {
  func.func @_kernel_resident(%arg0: i32, %arg1: memref<16x64xf32, #tpu.memory_space<vmem>>, %arg2: memref<64x128xf32, #tpu.memory_space<vmem>>, %arg3: memref<1x128xf32, #tpu.memory_space<vmem>>, %arg4: memref<16x128xf32, #tpu.memory_space<vmem>>, %arg5: memref<1x128xf32, #tpu.memory_space<vmem>>, %arg6: memref<1x128xf32, #tpu.memory_space<vmem>>, %arg7: memref<16x128xf32, #tpu.memory_space<vmem>>) attributes {dimension_semantics = [#tpu.dimension_semantics<parallel>], iteration_bounds = array<i64: 1>, scalar_prefetch = 0 : i64, scratch_operands = 0 : i64, tpu.core_type = #tpu.core_type<tc>, window_params = [{transform_indices = @transform_0, window_bounds = array<i64: 16, 64>}, {pipeline_mode = #tpu.pipeline_mode<synchronous>, transform_indices = @transform_1, window_bounds = array<i64: 64, 128>}, {pipeline_mode = #tpu.pipeline_mode<synchronous>, transform_indices = @transform_2, window_bounds = array<i64: 1, 128>}, {transform_indices = @transform_3, window_bounds = array<i64: 16, 128>}, {pipeline_mode = #tpu.pipeline_mode<synchronous>, transform_indices = @transform_4, window_bounds = array<i64: 1, 128>}, {pipeline_mode = #tpu.pipeline_mode<synchronous>, transform_indices = @transform_5, window_bounds = array<i64: 1, 128>}, {transform_indices = @transform_6, window_bounds = array<i64: 16, 128>}]} {
    %c0 = arith.constant 0 : index
    %c0_0 = arith.constant 0 : index
    %0 = vector.load %arg1[%c0, %c0_0] : memref<16x64xf32, #tpu.memory_space<vmem>>, vector<16x64xf32>
    %c0_1 = arith.constant 0 : index
    %c0_2 = arith.constant 0 : index
    %1 = vector.load %arg2[%c0_1, %c0_2] : memref<64x128xf32, #tpu.memory_space<vmem>>, vector<64x128xf32>
    %cst = arith.constant dense<0.000000e+00> : vector<16x128xf32>
    %2 = tpu.matmul %0, %1, %cst {dimension_numbers = #tpu.dot_dimension_numbers<[1], [0], [0], [1], [0, 0, 1, 1], [], []>} : vector<16x64xf32>, vector<64x128xf32>, vector<16x128xf32> -> vector<16x128xf32>
    %c0_3 = arith.constant 0 : index
    %c0_4 = arith.constant 0 : index
    %3 = vector.load %arg3[%c0_3, %c0_4] : memref<1x128xf32, #tpu.memory_space<vmem>>, vector<1x128xf32>
    %4 = vector.broadcast %3 : vector<1x128xf32> to vector<16x128xf32>
    %5 = arith.addf %2, %4 : vector<16x128xf32>
    %c0_5 = arith.constant 0 : index
    %c0_6 = arith.constant 0 : index
    %6 = vector.load %arg4[%c0_5, %c0_6] : memref<16x128xf32, #tpu.memory_space<vmem>>, vector<16x128xf32>
    %7 = arith.addf %5, %6 : vector<16x128xf32>
    %c0_7 = arith.constant 0 : index
    %c0_8 = arith.constant 0 : index
    %8 = vector.load %arg5[%c0_7, %c0_8] : memref<1x128xf32, #tpu.memory_space<vmem>>, vector<1x128xf32>
    %c0_9 = arith.constant 0 : index
    %c0_10 = arith.constant 0 : index
    %9 = vector.load %arg6[%c0_9, %c0_10] : memref<1x128xf32, #tpu.memory_space<vmem>>, vector<1x128xf32>
    %cst_11 = arith.constant dense<0.000000e+00> : vector<16xf32>
    %10 = vector.multi_reduction <add>, %7, %cst_11 [1] : vector<16x128xf32> to vector<16xf32>
    %11 = vector.shape_cast %10 : vector<16xf32> to vector<16x1xf32>
    %cst_12 = arith.constant 3.125000e-02 : f32
    %12 = vector.broadcast %cst_12 : f32 to vector<16x1xf32>
    %13 = arith.mulf %11, %12 : vector<16x1xf32>
    %14 = arith.mulf %7, %7 : vector<16x128xf32>
    %cst_13 = arith.constant dense<0.000000e+00> : vector<16xf32>
    %15 = vector.multi_reduction <add>, %14, %cst_13 [1] : vector<16x128xf32> to vector<16xf32>
    %16 = vector.shape_cast %15 : vector<16xf32> to vector<16x1xf32>
    %cst_14 = arith.constant 3.125000e-02 : f32
    %17 = vector.broadcast %cst_14 : f32 to vector<16x1xf32>
    %18 = arith.mulf %16, %17 : vector<16x1xf32>
    %19 = arith.mulf %13, %13 : vector<16x1xf32>
    %20 = arith.subf %18, %19 : vector<16x1xf32>
    %cst_15 = arith.constant 0.000000e+00 : f32
    %21 = vector.broadcast %cst_15 : f32 to vector<16x1xf32>
    %22 = arith.maximumf %20, %21 : vector<16x1xf32>
    %23 = vector.broadcast %13 : vector<16x1xf32> to vector<16x128xf32>
    %24 = arith.subf %7, %23 : vector<16x128xf32>
    %cst_16 = arith.constant 9.99999996E-13 : f32
    %25 = vector.broadcast %cst_16 : f32 to vector<16x1xf32>
    %26 = arith.addf %22, %25 : vector<16x1xf32>
    %27 = math.rsqrt %26 : vector<16x1xf32>
    %28 = vector.broadcast %27 : vector<16x1xf32> to vector<16x128xf32>
    %29 = arith.mulf %24, %28 : vector<16x128xf32>
    %30 = vector.broadcast %8 : vector<1x128xf32> to vector<16x128xf32>
    %31 = arith.mulf %30, %29 : vector<16x128xf32>
    %32 = vector.broadcast %9 : vector<1x128xf32> to vector<16x128xf32>
    %33 = arith.addf %31, %32 : vector<16x128xf32>
    %c0_17 = arith.constant 0 : index
    %c0_18 = arith.constant 0 : index
    %34 = vector.load %arg7[%c0_17, %c0_18] : memref<16x128xf32, #tpu.memory_space<vmem>>, vector<16x128xf32>
    tpu.vector_store %arg7[%c0_17, %c0_18], %33 {strides = array<i32>} : memref<16x128xf32, #tpu.memory_space<vmem>>, vector<16x128xf32>,
    return
  }
  func.func @transform_0(%arg0: i32) -> (i32, i32) {
    %c0_i32 = arith.constant 0 : i32
    %c0_i32_0 = arith.constant 0 : i32
    return %arg0, %c0_i32 : i32, i32
  }
  func.func @transform_1(%arg0: i32) -> (i32, i32) {
    %c0_i32 = arith.constant 0 : i32
    %c0_i32_0 = arith.constant 0 : i32
    %c0_i32_1 = arith.constant 0 : i32
    return %c0_i32, %c0_i32_0 : i32, i32
  }
  func.func @transform_2(%arg0: i32) -> (i32, i32) {
    %c0_i32 = arith.constant 0 : i32
    %c0_i32_0 = arith.constant 0 : i32
    %c0_i32_1 = arith.constant 0 : i32
    return %c0_i32, %c0_i32_0 : i32, i32
  }
  func.func @transform_3(%arg0: i32) -> (i32, i32) {
    %c0_i32 = arith.constant 0 : i32
    %c0_i32_0 = arith.constant 0 : i32
    return %arg0, %c0_i32 : i32, i32
  }
  func.func @transform_4(%arg0: i32) -> (i32, i32) {
    %c0_i32 = arith.constant 0 : i32
    %c0_i32_0 = arith.constant 0 : i32
    %c0_i32_1 = arith.constant 0 : i32
    return %c0_i32, %c0_i32_0 : i32, i32
  }
  func.func @transform_5(%arg0: i32) -> (i32, i32) {
    %c0_i32 = arith.constant 0 : i32
    %c0_i32_0 = arith.constant 0 : i32
    %c0_i32_1 = arith.constant 0 : i32
    return %c0_i32, %c0_i32_0 : i32, i32
  }
  func.func @transform_6(%arg0: i32) -> (i32, i32) {
    %c0_i32 = arith.constant 0 : i32
    %c0_i32_0 = arith.constant 0 : i32
    return %arg0, %c0_i32 : i32, i32
  }
}

</mosaic_0001>

<bundles_post_ra>
// kernel: forward.1
= control target key start
LH: loop header
LB: loop body
LE: loop exit
PB: predicated region body
PF: predicated region fallthrough
CT: control target
= control target key end

     0   :  { %11 = vsyncpa [#allocation3], 0  ;;  %s256_s21 = smov [#allocation2]   ;;  %s326_s0 = inlined_call_operand.vmem [shape: f32[16,64], index: 0, kind: input, shape index: {}]   ;;  %s327_s1 = inlined_call_operand.hbm [shape: f32[64,128], index: 1, kind: input, shape index: {}]   ;;  %s328_s2 = inlined_call_operand.vmem [shape: f32[1,128], index: 2, kind: input, shape index: {}]   ;;  %s329_s3 = inlined_call_operand.vmem [shape: f32[16,128], index: 3, kind: input, shape index: {}]   ;;  %s330_s4 = inlined_call_operand.vmem [shape: f32[1,128], index: 4, kind: input, shape index: {}]   ;;  %s331_s5 = inlined_call_operand.vmem [shape: f32[1,128], index: 5, kind: input, shape index: {}]   ;;  %s332_s6 = inlined_call_operand.vmem [shape: f32[16,128], index: 6, kind: output, shape index: {}]  }
   0x1   :  { %s19_s22 = sshll.u32 %s256_s21, 4  ;;  %s20_s22 = int_to_ptr.vmem [resolvable:$true] %s19_s22 }
   0x2   :  { %s242_s23 = scalar_lea.vmem %s20_s22, 1024  ;;  %p247_p1 = scmp.lt.s32.totalorder %s20_s22, %s20_s22 }
   0x3   :  { %p243_p0 = scmp.ne.s32.totalorder %s20_s22, %s242_s23  ;;  %p248_p2 = scmp.lt.s32.totalorder %s242_s23, %s242_s23 }
   0x5   :  { %p249_p3 = por %p248_p2, %p247_p1 }
   0x7   :  { %p250_p4 = pnand %p249_p3, %p243_p0 }
   0x9   :  { %253 = shalt.err (!%p250_p4)
}
   0xa   :  { %s257_s24 = smov 128   ;;  %s258_s25 = smov 8  }
   0xb   :  { %25 = dma.hbm_to_vmem [thread:$0]  %s327_s1, 1024, %s20_s22, [#allocation3], %s257_s24, %s257_s24, %s258_s25  }
   0xc   :  { %254 = dma.done.wait [#allocation3], 1024  }
   0xd   :  { %255 = vsyncadd [#allocation3], 4294966272  ;;  %v46_v0 = vld [vmem:[#allocation2 + $0x38] sm:$0xff]  ;;  %v45_v1 = vld [vmem:[#allocation2 + $0x30] sm:$0xff]  ;;  %vm54_vm0 = vcmask 523264  }
   0xe   :  { %208 = vmatprep.subr.mxu0 %v46_v0  ;;  %v44_v2 = vld [vmem:[#allocation2 + $0x28] sm:$0xff]  ;;  %v37_v3 = vld [vmem:[%s326_s0] sm:$0xff]  ;;  %v42_v5 = vld [vmem:[#allocation2 + $0x18] sm:$0xff] }
   0xf   :  { %209 = vmatpush3.msra.mxu0 %v46_v0  ;;  %224 = vmatprep.mubr.msk.f32.mxu0 %vm54_vm0, %v37_v3  ;;  %v43_v4 = vld [vmem:[#allocation2 + $0x20] sm:$0xff]  ;;  %v41_v6 = vld [vmem:[#allocation2 + $0x10] sm:$0xff]  ;;  %v40_v7 = vld [vmem:[#allocation2 + $0x8] sm:$0xff] }
  0x10   :  { %210 = vmatprep.subr.mxu0 %v45_v1  ;;  %v39_v8 = vld [vmem:[#allocation2] sm:$0xff]  ;;  %v38_v9 = vld [vmem:[%s326_s0 + $0x8] sm:$0xff] }
  0x11   :  { %211 = vmatpush3.msra.mxu0 %v45_v1  ;;  %v193_v11 = vld [vmem:[%s328_s2] ss:$0 sm:$0xff]  ;;  %v137_v16 = vld [vmem:[%s329_s3 + $0x8] sm:$0xff] }
  0x12   :  { %212 = vmatprep.subr.mxu0 %v44_v2  ;;  %v136_v13 = vld [vmem:[%s329_s3] sm:$0xff] }
  0x13   :  { %213 = vmatpush3.msra.mxu0 %v44_v2  ;;  %v196_v39 = vld [vmem:[%s330_s4] ss:$0 sm:$0xff] }
  0x14   :  { %214 = vmatprep.subr.mxu0 %v43_v4  ;;  %v197_v41 = vld [vmem:[%s331_s5] ss:$0 sm:$0xff] }
  0x15   :  { %215 = vmatpush3.msra.mxu0 %v43_v4 }
  0x16   :  { %216 = vmatprep.subr.mxu0 %v42_v5 }
  0x17   :  { %217 = vmatpush3.msra.mxu0 %v42_v5 }
  0x18   :  { %218 = vmatprep.subr.mxu0 %v41_v6 }
  0x19   :  { %219 = vmatpush3.msra.mxu0 %v41_v6 }
  0x1a   :  { %220 = vmatprep.subr.mxu0 %v40_v7 }
  0x1b   :  { %221 = vmatpush3.msra.mxu0 %v40_v7 }
  0x1c   :  { %222 = vmatprep.subr.mxu0 %v39_v8 }
  0x1d   :  { %223 = vmatpush3.msra.mxu0 %v39_v8 }
  0x1e   :  { %225 = vmatmul.mubr.msk.f32.vlgmr.msra.gmra.mxu0 %vm54_vm0, %v38_v9 }
  0xde   :  { %v226_v10 = vpop.f32.mrf.mxu0 }
  0xdf   :  { %v133_v14 = vadd.f32 %v226_v10, %v193_v11 }
  0xe0   :  { %v127_v12 = vpop.f32.mrf.mxu0 }
  0xe1   :  { %v128_v15 = vadd.f32 %v193_v11, %v127_v12  ;;  %v139_v18 = vadd.f32 %v137_v16, %v133_v14 }
  0xe3   :  { %v138_v17 = vadd.f32 %v136_v13, %v128_v15  ;;  %v149_v20 = vmul.f32 %v139_v18, %v139_v18 }
  0xe5   :  { %142 = vadd.xlane.f32.xlu0 %v138_v17  ;;  %v148_v19 = vmul.f32 %v138_v17, %v138_v17 }
  0xe7   :  { %150 = vadd.xlane.f32.xlu1 %v148_v19 }
  0xe9   :  { %144 = vadd.xlane.f32.xlu0 %v139_v18 }
  0xeb   :  { %152 = vadd.xlane.f32.xlu1 %v149_v20 }
 0x16e   :  { %v143_v21 = vpop.xlane.xlu0 %142 }
 0x16f   :  { %v146_v22 = vmul.f32 0.03125, %v143_v21 }
 0x170   :  { %v151_v23 = vpop.xlane.xlu1 %150 }
 0x171   :  { %v156_v24 = vmul.f32 %v146_v22, %v146_v22  ;;  %v154_v25 = vmul.f32 0.03125, %v151_v23  ;;  %v162_v37 = vsub.f32 %v138_v17, %v146_v22 }
 0x172   :  { %v145_v26 = vpop.xlane.xlu0 %144 }
 0x173   :  { %v158_v27 = vsub.f32 %v154_v25, %v156_v24  ;;  %v147_v28 = vmul.f32 0.03125, %v145_v26 }
 0x174   :  { %v153_v29 = vpop.xlane.xlu1 %152 }
 0x175   :  { %v160_v30 = vmax.f32 %v158_v27, 0.0  ;;  %v157_v31 = vmul.f32 %v147_v28, %v147_v28  ;;  %v155_v32 = vmul.f32 0.03125, %v153_v29  ;;  %v163_v43 = vsub.f32 %v139_v18, %v147_v28 }
 0x177   :  { %v164_v33 = vadd.f32 1e-12, %v160_v30  ;;  %v159_v34 = vsub.f32 %v155_v32, %v157_v31 }
 0x179   :  { %230 = vrsqrt.f32 %v164_v33  ;;  %v161_v35 = vmax.f32 %v159_v34, 0.0 }
 0x17b   :  { %v165_v36 = vadd.f32 1e-12, %v161_v35 }
 0x17d   :  { %232 = vrsqrt.f32 %v165_v36 }
 0x186   :  { %v231_v38 = vpop.eup %230 }
 0x187   :  { %v168_v40 = vmul.f32 %v231_v38, %v162_v37 }
 0x189   :  { %v176_v42 = vmul.f32 %v196_v39, %v168_v40 }
 0x18a   :  { %v233_v44 = vpop.eup %232 }
 0x18b   :  { %v184_v45 = vadd.f32 %v197_v41, %v176_v42  ;;  %v169_v46 = vmul.f32 %v233_v44, %v163_v43 }
 0x18d   :  { %186 = vst [vmem:[%s332_s6] sm:$0xff] %v184_v45  ;;  %v177_v47 = vmul.f32 %v196_v39, %v169_v46 }
 0x18f   :  { %v185_v48 = vadd.f32 %v197_v41, %v177_v47 }
 0x191   :  { %187 = vst [vmem:[%s332_s6 + $0x8] sm:$0xff] %v185_v48 }
 0x192   :  { %192 = vsyncpa [#allocation3], 1 }

</bundles_post_ra>
